<compile_context>
chip_gen: v6e
topology: v6e:2x2x1
jax: 0.10.0
libtpu: 0.0.40
codegen_flags: <defaults>
</compile_context>

<pallas_src>
import jax
import jax.numpy as jnp
from jax.experimental import pallas as pl
from jax.experimental.pallas import tpu as pltpu

HIDDEN_DIM = 256
TB_MAX = 1024   # max batch-tile rows
TB_MIN = 256    # below this, splitting costs more (per-step ~0.35 us) than it hides


def _cdiv(a, b):
    return -(-a // b)


def _round_up(n, m):
    return ((n + m - 1) // m) * m


def _pick_batch_tile(batch):
    """Pick (tile_rows, grid_steps).

    Guarantees >= 2 grid steps whenever the batch allows, so the BlockSpec pipeline
    has something to overlap and the 'parallel' grid axis can be sharded across both
    v7x TensorCores.  Partial last tiles are fine: Pallas masks the boundary writes.
    """
    if batch <= TB_MIN:
        return batch, 1                      # too small to split usefully
    tb = min(TB_MAX, max(TB_MIN, _round_up(_cdiv(batch, 8), 16)))
    return tb, _cdiv(batch, tb)


def mlp_kernel(x_ref, w1_ref, b1_ref, w2_ref, b2_ref, w3_ref, b3_ref, o_ref):
    # Fused 3-layer MLP on one batch tile: bf16 operands into the MXU with f32
    # accumulation; bias add + ReLU epilogues in f32 on the VPU; intermediates
    # never round-trip to HBM.
    x = x_ref[...].astype(jnp.bfloat16)                      # in-kernel f32 -> bf16
    h = jnp.dot(x, w1_ref[...], preferred_element_type=jnp.float32) + b1_ref[...]
    h = jnp.maximum(h, 0.0).astype(jnp.bfloat16)
    h = jnp.dot(h, w2_ref[...], preferred_element_type=jnp.float32) + b2_ref[...]
    h = jnp.maximum(h, 0.0).astype(jnp.bfloat16)
    out = jnp.dot(h, w3_ref[...], preferred_element_type=jnp.float32) + b3_ref[...]
    o_ref[...] = out.astype(o_ref.dtype)                     # unpadded (tb, out_dim) bf16


@jax.jit
def mlp_forward(x, params):
    (w1, b1), (w2, b2), (w3, b3) = params
    B, in_dim = x.shape
    hidden = w1.shape[1]
    out_dim = w3.shape[1]

    tb, steps = _pick_batch_tile(B)

    # One-time bf16 cast of the (tiny) weights; biases stay f32 for the f32 epilogue.
    w1b = w1.astype(jnp.bfloat16)
    w2b = w2.astype(jnp.bfloat16)
    w3b = w3.astype(jnp.bfloat16)
    b1f = b1.reshape(1, hidden).astype(jnp.float32)
    b2f = b2.reshape(1, hidden).astype(jnp.float32)
    b3f = b3.reshape(1, out_dim).astype(jnp.float32)

    def resident(shape):
        # Same block every grid step -> weights/biases stay VMEM-resident.
        return pl.BlockSpec(shape, lambda i: (0, 0))

    out = pl.pallas_call(
        mlp_kernel,
        out_shape=jax.ShapeDtypeStruct((B, out_dim), jnp.bfloat16),
        grid=(steps,),
        in_specs=[
            pl.BlockSpec((tb, in_dim), lambda i: (i, 0)),    # x streams, unpadded
            resident((in_dim, hidden)),                      # w1
            resident((1, hidden)),                           # b1
            resident((hidden, hidden)),                      # w2
            resident((1, hidden)),                           # b2
            resident((hidden, out_dim)),                     # w3, unpadded cols
            resident((1, out_dim)),                          # b3
        ],
        out_specs=pl.BlockSpec((tb, out_dim), lambda i: (i, 0)),
        compiler_params=pltpu.CompilerParams(
            dimension_semantics=("parallel",),   # shard batch tiles across v7x's 2 TCs
            vmem_limit_bytes=32 * 1024 * 1024,   # ample headroom; well under v7x's 64 MiB
        ),
    )(x, w1b, b1f, w2b, b2f, w3b, b3f)

    # Caller (and the PyTorch reference) works in f32; upcasting (B, out_dim) is tiny.
    return out.astype(x.dtype)


def orthogonal_linear_params(key, in_dim, out_dim, dtype=jnp.float32):
    # Matches nn.init.orthogonal_(weight, gain=1) on a PyTorch (out, in) weight,
    # then transposed to (in, out) for x @ W; bias initialized to zeros.
    w_pt = jax.nn.initializers.orthogonal(scale=1.0)(key, (out_dim, in_dim), dtype)
    w = jnp.transpose(w_pt)                       # (in, out)
    b = jnp.zeros((1, out_dim), dtype=dtype)
    return w, b


def make_params(key, input_dim, output_dim):
    k1, k2, k3 = jax.random.split(key, 3)
    p1 = orthogonal_linear_params(k1, input_dim, HIDDEN_DIM)
    p2 = orthogonal_linear_params(k2, HIDDEN_DIM, HIDDEN_DIM)
    p3 = orthogonal_linear_params(k3, HIDDEN_DIM, output_dim)
    return (p1, p2, p3)


def mlp_reference(x, params):
    # Pure f32 reference of the original PyTorch forward.
    (w1, b1), (w2, b2), (w3, b3) = params
    h = jnp.maximum(x @ w1 + b1, 0.0)
    h = jnp.maximum(h @ w2 + b2, 0.0)
    return h @ w3 + b3


if __name__ == "__main__":
    key = jax.random.PRNGKey(0)
    k_params, k_x1, k_x2 = jax.random.split(key, 3)

    input_dim, output_dim = 16, 4
    params = make_params(k_params, input_dim, output_dim)

    # Small batch: single-step grid path.
    x_small = jax.random.normal(k_x1, (8, input_dim), dtype=jnp.float32)
    out_small = jax.block_until_ready(mlp_forward(x_small, params))
    ref_small = mlp_reference(x_small, params)
    assert out_small.shape == (8, output_dim)
    # bf16 MXU operands / bf16 output with f32 accumulation: bf16-appropriate tolerance.
    assert jnp.allclose(out_small, ref_small, atol=5e-2, rtol=5e-2), \
        float(jnp.max(jnp.abs(out_small - ref_small)))

    # Larger batch exercises the multi-step (pipelined / megacore-parallel) grid.
    x_big = jax.random.normal(k_x2, (512, input_dim), dtype=jnp.float32)
    out_big = jax.block_until_ready(mlp_forward(x_big, params))
    ref_big = mlp_reference(x_big, params)
    assert out_big.shape == (512, output_dim)
    assert jnp.allclose(out_big, ref_big, atol=5e-2, rtol=5e-2), \
        float(jnp.max(jnp.abs(out_big - ref_big)))

    print("KERNEL_OK")
</pallas_src>

<mosaic_0001>
module attributes {stable_mosaic.version = 11 : i64} {
  func.func @mlp_kernel(%arg0: i32, %arg1: memref<8x16xf32, #tpu.memory_space<vmem>>, %arg2: memref<16x256xbf16, #tpu.memory_space<vmem>>, %arg3: memref<1x256xf32, #tpu.memory_space<vmem>>, %arg4: memref<256x256xbf16, #tpu.memory_space<vmem>>, %arg5: memref<1x256xf32, #tpu.memory_space<vmem>>, %arg6: memref<256x4xbf16, #tpu.memory_space<vmem>>, %arg7: memref<1x4xf32, #tpu.memory_space<vmem>>, %arg8: memref<8x4xbf16, #tpu.memory_space<vmem>>) attributes {dimension_semantics = [#tpu.dimension_semantics<parallel>], iteration_bounds = array<i64: 1>, scalar_prefetch = 0 : i64, scratch_operands = 0 : i64, tpu.core_type = #tpu.core_type<tc>, window_params = [{transform_indices = @transform_0, window_bounds = array<i64: 8, 16>}, {pipeline_mode = #tpu.pipeline_mode<synchronous>, transform_indices = @transform_1, window_bounds = array<i64: 16, 256>}, {pipeline_mode = #tpu.pipeline_mode<synchronous>, transform_indices = @transform_2, window_bounds = array<i64: 1, 256>}, {pipeline_mode = #tpu.pipeline_mode<synchronous>, transform_indices = @transform_3, window_bounds = array<i64: 256, 256>}, {pipeline_mode = #tpu.pipeline_mode<synchronous>, transform_indices = @transform_4, window_bounds = array<i64: 1, 256>}, {pipeline_mode = #tpu.pipeline_mode<synchronous>, transform_indices = @transform_5, window_bounds = array<i64: 256, 4>}, {pipeline_mode = #tpu.pipeline_mode<synchronous>, transform_indices = @transform_6, window_bounds = array<i64: 1, 4>}, {transform_indices = @transform_7, window_bounds = array<i64: 8, 4>}]} {
    %c0 = arith.constant 0 : index
    %c0_0 = arith.constant 0 : index
    %0 = vector.load %arg1[%c0, %c0_0] : memref<8x16xf32, #tpu.memory_space<vmem>>, vector<8x16xf32>
    %1 = arith.truncf %0 : vector<8x16xf32> to vector<8x16xbf16>
    %c0_1 = arith.constant 0 : index
    %c0_2 = arith.constant 0 : index
    %2 = vector.load %arg2[%c0_1, %c0_2] : memref<16x256xbf16, #tpu.memory_space<vmem>>, vector<16x256xbf16>
    %cst = arith.constant dense<0.000000e+00> : vector<8x256xf32>
    %3 = tpu.matmul %1, %2, %cst {dimension_numbers = #tpu.dot_dimension_numbers<[1], [0], [0], [1], [0, 0, 1, 1], [], []>} : vector<8x16xbf16>, vector<16x256xbf16>, vector<8x256xf32> -> vector<8x256xf32>
    %c0_3 = arith.constant 0 : index
    %c0_4 = arith.constant 0 : index
    %4 = vector.load %arg3[%c0_3, %c0_4] : memref<1x256xf32, #tpu.memory_space<vmem>>, vector<1x256xf32>
    %5 = vector.broadcast %4 : vector<1x256xf32> to vector<8x256xf32>
    %6 = arith.addf %3, %5 : vector<8x256xf32>
    %cst_5 = arith.constant 0.000000e+00 : f32
    %7 = vector.broadcast %cst_5 : f32 to vector<8x256xf32>
    %8 = arith.maximumf %6, %7 : vector<8x256xf32>
    %9 = arith.truncf %8 : vector<8x256xf32> to vector<8x256xbf16>
    %c0_6 = arith.constant 0 : index
    %c0_7 = arith.constant 0 : index
    %10 = vector.load %arg4[%c0_6, %c0_7] : memref<256x256xbf16, #tpu.memory_space<vmem>>, vector<256x256xbf16>
    %cst_8 = arith.constant dense<0.000000e+00> : vector<8x256xf32>
    %11 = tpu.matmul %9, %10, %cst_8 {dimension_numbers = #tpu.dot_dimension_numbers<[1], [0], [0], [1], [0, 0, 1, 1], [], []>} : vector<8x256xbf16>, vector<256x256xbf16>, vector<8x256xf32> -> vector<8x256xf32>
    %c0_9 = arith.constant 0 : index
    %c0_10 = arith.constant 0 : index
    %12 = vector.load %arg5[%c0_9, %c0_10] : memref<1x256xf32, #tpu.memory_space<vmem>>, vector<1x256xf32>
    %13 = vector.broadcast %12 : vector<1x256xf32> to vector<8x256xf32>
    %14 = arith.addf %11, %13 : vector<8x256xf32>
    %cst_11 = arith.constant 0.000000e+00 : f32
    %15 = vector.broadcast %cst_11 : f32 to vector<8x256xf32>
    %16 = arith.maximumf %14, %15 : vector<8x256xf32>
    %17 = arith.truncf %16 : vector<8x256xf32> to vector<8x256xbf16>
    %c0_12 = arith.constant 0 : index
    %c0_13 = arith.constant 0 : index
    %18 = vector.load %arg6[%c0_12, %c0_13] : memref<256x4xbf16, #tpu.memory_space<vmem>>, vector<256x4xbf16>
    %cst_14 = arith.constant dense<0.000000e+00> : vector<8x4xf32>
    %19 = tpu.matmul %17, %18, %cst_14 {dimension_numbers = #tpu.dot_dimension_numbers<[1], [0], [0], [1], [0, 0, 1, 1], [], []>} : vector<8x256xbf16>, vector<256x4xbf16>, vector<8x4xf32> -> vector<8x4xf32>
    %c0_15 = arith.constant 0 : index
    %c0_16 = arith.constant 0 : index
    %20 = vector.load %arg7[%c0_15, %c0_16] : memref<1x4xf32, #tpu.memory_space<vmem>>, vector<1x4xf32>
    %21 = vector.broadcast %20 : vector<1x4xf32> to vector<8x4xf32>
    %22 = arith.addf %19, %21 : vector<8x4xf32>
    %23 = arith.truncf %22 : vector<8x4xf32> to vector<8x4xbf16>
    %c0_17 = arith.constant 0 : index
    %c0_18 = arith.constant 0 : index
    %24 = vector.load %arg8[%c0_17, %c0_18] : memref<8x4xbf16, #tpu.memory_space<vmem>>, vector<8x4xbf16>
    tpu.vector_store %arg8[%c0_17, %c0_18], %23 {strides = array<i32>} : memref<8x4xbf16, #tpu.memory_space<vmem>>, vector<8x4xbf16>,
    return
  }
  func.func @transform_0(%arg0: i32) -> (i32, i32) {
    %c0_i32 = arith.constant 0 : i32
    %c0_i32_0 = arith.constant 0 : i32
    return %arg0, %c0_i32 : i32, i32
  }
  func.func @transform_1(%arg0: i32) -> (i32, i32) {
    %c0_i32 = arith.constant 0 : i32
    %c0_i32_0 = arith.constant 0 : i32
    %c0_i32_1 = arith.constant 0 : i32
    return %c0_i32, %c0_i32_0 : i32, i32
  }
  func.func @transform_2(%arg0: i32) -> (i32, i32) {
    %c0_i32 = arith.constant 0 : i32
    %c0_i32_0 = arith.constant 0 : i32
    %c0_i32_1 = arith.constant 0 : i32
    return %c0_i32, %c0_i32_0 : i32, i32
  }
  func.func @transform_3(%arg0: i32) -> (i32, i32) {
    %c0_i32 = arith.constant 0 : i32
    %c0_i32_0 = arith.constant 0 : i32
    %c0_i32_1 = arith.constant 0 : i32
    return %c0_i32, %c0_i32_0 : i32, i32
  }
  func.func @transform_4(%arg0: i32) -> (i32, i32) {
    %c0_i32 = arith.constant 0 : i32
    %c0_i32_0 = arith.constant 0 : i32
    %c0_i32_1 = arith.constant 0 : i32
    return %c0_i32, %c0_i32_0 : i32, i32
  }
  func.func @transform_5(%arg0: i32) -> (i32, i32) {
    %c0_i32 = arith.constant 0 : i32
    %c0_i32_0 = arith.constant 0 : i32
    %c0_i32_1 = arith.constant 0 : i32
    return %c0_i32, %c0_i32_0 : i32, i32
  }
  func.func @transform_6(%arg0: i32) -> (i32, i32) {
    %c0_i32 = arith.constant 0 : i32
    %c0_i32_0 = arith.constant 0 : i32
    %c0_i32_1 = arith.constant 0 : i32
    return %c0_i32, %c0_i32_0 : i32, i32
  }
  func.func @transform_7(%arg0: i32) -> (i32, i32) {
    %c0_i32 = arith.constant 0 : i32
    %c0_i32_0 = arith.constant 0 : i32
    return %arg0, %c0_i32 : i32, i32
  }
}

</mosaic_0001>

<bundles_post_ra>
// kernel: mlp_forward.1
= control target key start
LH: loop header
LB: loop body
LE: loop exit
PB: predicated region body
PF: predicated region fallthrough
CT: control target
= control target key end

     0   :  { %v675_v1 = vmov 0   ;;  %vm53_vm0 = vcmask 130048   ;;  %v33_v49 = vlaneseq  ;;  %vm527_vm1 = vcmask 27648   ;;  %s881_s1 = inlined_call_operand.vmem [shape: bf16[16,256], index: 1, kind: input, shape index: {}]   ;;  %s882_s0 = inlined_call_operand.vmem [shape: f32[8,16], index: 0, kind: input, shape index: {}]   ;;  %s883_s3 = inlined_call_operand.vmem [shape: bf16[256,256], index: 3, kind: input, shape index: {}]   ;;  %s884_s5 = inlined_call_operand.vmem [shape: bf16[256,4], index: 5, kind: input, shape index: {}]   ;;  %s885_s2 = inlined_call_operand.vmem [shape: f32[1,256], index: 2, kind: input, shape index: {}]   ;;  %s886_s4 = inlined_call_operand.vmem [shape: f32[1,256], index: 4, kind: input, shape index: {}]   ;;  %s887_s6 = inlined_call_operand.vmem [shape: f32[1,4], index: 6, kind: input, shape index: {}]   ;;  %s888_s7 = inlined_call_operand.vmem [shape: bf16[8,4], index: 7, kind: output, shape index: {}]  }
   0x1   :  { %v608_v0 = vld [vmem:[%s881_s1 + $0x4] ss:$8 sps:$4 sm:$0xff]   ;;  %89 = vmatprep.mubr.bf16.mxu0 %v675_v1  ;;  %v610_v2 = vld [vmem:[%s881_s1] ss:$8 sps:$4 sm:$0xff]   ;;  %v611_v5 = vld [vmem:[%s883_s3 + $0x74] ss:$8 sps:$4 sm:$0xff]  }
   0x2   :  { %v27_v3 = vld [vmem:[%s882_s0] sm:$0xff]  ;;  %71 = vmatprep.subr.bf16.mxu0 %v608_v0  ;;  %v613_v6 = vld [vmem:[%s883_s3 + $0x70] ss:$8 sps:$4 sm:$0xff]   ;;  %306 = vmatprep.subr.bf16.mxu1 %v611_v5  ;;  %v617_v9 = vld [vmem:[%s883_s3 + $0x54] ss:$8 sps:$4 sm:$0xff]   ;;  %v34_v50 = vshrl.u32 %v33_v49, 7 }
   0x3   :  { %v28_v4 = vpack.c.bf16 %v27_v3, %v27_v3  ;;  %72 = vmatpush1.bf16.msra.mxu0 %v610_v2  ;;  %v614_v7 = vld [vmem:[%s883_s3 + $0x64] ss:$8 sps:$4 sm:$0xff]   ;;  %307 = vmatpush1.bf16.msra.mxu1 %v613_v6  ;;  %v616_v8 = vld [vmem:[%s883_s3 + $0x60] ss:$8 sps:$4 sm:$0xff]   ;;  %v619_v10 = vld [vmem:[%s883_s3 + $0x50] ss:$8 sps:$4 sm:$0xff]  }
   0x4   :  { %308 = vmatprep.subr.bf16.mxu1 %v614_v7  ;;  %v620_v11 = vld [vmem:[%s883_s3 + $0x44] ss:$8 sps:$4 sm:$0xff]   ;;  %v622_v12 = vld [vmem:[%s883_s3 + $0x40] ss:$8 sps:$4 sm:$0xff]   ;;  %v623_v13 = vld [vmem:[%s883_s3 + $0x34] ss:$8 sps:$4 sm:$0xff]  }
   0x5   :  { %v625_v14 = vld [vmem:[%s883_s3 + $0x30] ss:$8 sps:$4 sm:$0xff]   ;;  %v626_v15 = vld [vmem:[%s883_s3 + $0x24] ss:$8 sps:$4 sm:$0xff]   ;;  %v628_v16 = vld [vmem:[%s883_s3 + $0x20] ss:$8 sps:$4 sm:$0xff]  }
   0x6   :  { %535 = vmatmul.mubr.msk.bf16.vlgmr.msra.gmra.mxu0 %vm53_vm0, %v28_v4  ;;  %v629_v17 = vld [vmem:[%s883_s3 + $0x14] ss:$8 sps:$4 sm:$0xff]   ;;  %v631_v18 = vld [vmem:[%s883_s3 + $0x10] ss:$8 sps:$4 sm:$0xff]   ;;  %v632_v19 = vld [vmem:[%s883_s3 + $0x4] ss:$8 sps:$4 sm:$0xff]  }
   0x7   :  { %309 = vmatpush1.bf16.msra.mxu1 %v616_v8  ;;  %v634_v20 = vld [vmem:[%s883_s3] ss:$8 sps:$4 sm:$0xff]   ;;  %v635_v21 = vld [vmem:[%s883_s3 + $0xf4] ss:$8 sps:$4 sm:$0xff]   ;;  %v637_v22 = vld [vmem:[%s883_s3 + $0xf0] ss:$8 sps:$4 sm:$0xff]  }
   0x8   :  { %310 = vmatprep.subr.bf16.mxu1 %v617_v9  ;;  %v638_v23 = vld [vmem:[%s883_s3 + $0xe4] ss:$8 sps:$4 sm:$0xff]   ;;  %v640_v24 = vld [vmem:[%s883_s3 + $0xe0] ss:$8 sps:$4 sm:$0xff]   ;;  %v641_v25 = vld [vmem:[%s883_s3 + $0xd4] ss:$8 sps:$4 sm:$0xff]  }
   0x9   :  { %v643_v26 = vld [vmem:[%s883_s3 + $0xd0] ss:$8 sps:$4 sm:$0xff]   ;;  %v644_v27 = vld [vmem:[%s883_s3 + $0xc4] ss:$8 sps:$4 sm:$0xff]   ;;  %v646_v28 = vld [vmem:[%s883_s3 + $0xc0] ss:$8 sps:$4 sm:$0xff]  }
   0xa   :  { %v647_v29 = vld [vmem:[%s883_s3 + $0xb4] ss:$8 sps:$4 sm:$0xff]   ;;  %v649_v30 = vld [vmem:[%s883_s3 + $0xb0] ss:$8 sps:$4 sm:$0xff]   ;;  %v650_v31 = vld [vmem:[%s883_s3 + $0xa4] ss:$8 sps:$4 sm:$0xff]  }
   0xb   :  { %311 = vmatpush1.bf16.msra.mxu1 %v619_v10  ;;  %v652_v32 = vld [vmem:[%s883_s3 + $0xa0] ss:$8 sps:$4 sm:$0xff]   ;;  %v653_v33 = vld [vmem:[%s883_s3 + $0x94] ss:$8 sps:$4 sm:$0xff]   ;;  %v655_v34 = vld [vmem:[%s883_s3 + $0x90] ss:$8 sps:$4 sm:$0xff]  }
   0xc   :  { %312 = vmatprep.subr.bf16.mxu1 %v620_v11  ;;  %v656_v35 = vld [vmem:[%s883_s3 + $0x84] ss:$8 sps:$4 sm:$0xff]   ;;  %v658_v36 = vld [vmem:[%s883_s3 + $0x80] ss:$8 sps:$4 sm:$0xff]   ;;  %v659_v37 = vld [vmem:[%s884_s5 + $0x78] sm:$0xff]   ;;  %v35_v51 = vsub.s32 0, %v34_v50 }
   0xd   :  { %v660_v38 = vld [vmem:[%s884_s5 + $0x38] sm:$0xff]   ;;  %585 = vmatprep.subr.bf16.mxu0 %v659_v37  ;;  %v661_v39 = vld [vmem:[%s884_s5 + $0x70] sm:$0xff]   ;;  %v663_v41 = vld [vmem:[%s884_s5 + $0x68] sm:$0xff]   ;;  %v39_v53 = vsub.s32 1, %v34_v50 }
   0xe   :  { %586 = vmatpush3.bf16.msra.mxu0 %v660_v38  ;;  %v662_v40 = vld [vmem:[%s884_s5 + $0x30] sm:$0xff]   ;;  %v664_v42 = vld [vmem:[%s884_s5 + $0x28] sm:$0xff]   ;;  %v665_v43 = vld [vmem:[%s884_s5 + $0x60] sm:$0xff]  }
   0xf   :  { %313 = vmatpush1.bf16.msra.mxu1 %v622_v12  ;;  %587 = vmatprep.subr.bf16.mxu0 %v661_v39  ;;  %v666_v44 = vld [vmem:[%s884_s5 + $0x20] sm:$0xff]   ;;  %v667_v45 = vld [vmem:[%s884_s5 + $0x58] sm:$0xff]   ;;  %v669_v47 = vld [vmem:[%s884_s5 + $0x50] sm:$0xff]  }
  0x10   :  { %314 = vmatprep.subr.bf16.mxu1 %v623_v13  ;;  %v668_v46 = vld [vmem:[%s884_s5 + $0x18] sm:$0xff]   ;;  %v670_v48 = vld [vmem:[%s884_s5 + $0x10] sm:$0xff]   ;;  %v31_v52 = vld [vmem:[%s885_s2] sm:$0x3] }
  0x11   :  { %v36_v54 = vrot.slane %v31_v52, %v35_v51  ;;  %v40_v55 = vrot.slane %v31_v52, %v39_v53  ;;  %v671_v2 = vld [vmem:[%s884_s5 + $0x48] sm:$0xff]   ;;  %v673_v4 = vld [vmem:[%s884_s5 + $0x40] sm:$0xff]  }
  0x12   :  { %588 = vmatpush3.bf16.msra.mxu0 %v662_v40  ;;  %v672_v3 = vld [vmem:[%s884_s5 + $0x8] sm:$0xff]   ;;  %v674_v5 = vld [vmem:[%s884_s5] sm:$0xff]  }
  0x13   :  { %315 = vmatpush1.bf16.msra.mxu1 %v625_v14  ;;  %589 = vmatprep.subr.bf16.mxu0 %v663_v41  ;;  %v134_v6 = vld [vmem:[%s886_s4] sm:$0x3] }
  0x14   :  { %316 = vmatprep.subr.bf16.mxu1 %v626_v15  ;;  %v139_v7 = vrot.slane %v134_v6, %v35_v51  ;;  %v143_v8 = vrot.slane %v134_v6, %v39_v53 }
  0x16   :  { %590 = vmatpush3.bf16.msra.mxu0 %v664_v42 }
  0x17   :  { %317 = vmatpush1.bf16.msra.mxu1 %v628_v16  ;;  %591 = vmatprep.subr.bf16.mxu0 %v665_v43 }
  0x18   :  { %318 = vmatprep.subr.bf16.mxu1 %v629_v17 }
  0x1a   :  { %592 = vmatpush3.bf16.msra.mxu0 %v666_v44 }
  0x1b   :  { %319 = vmatpush1.bf16.msra.mxu1 %v631_v18  ;;  %593 = vmatprep.subr.bf16.mxu0 %v667_v45 }
  0x1c   :  { %320 = vmatprep.subr.bf16.mxu1 %v632_v19 }
  0x1e   :  { %594 = vmatpush3.bf16.msra.mxu0 %v668_v46 }
  0x1f   :  { %321 = vmatpush1.bf16.msra.mxu1 %v634_v20  ;;  %595 = vmatprep.subr.bf16.mxu0 %v669_v47  ;;  %v568_v20 = vld [vmem:[%s887_s6] ss:$0 sm:$0xff] }
  0x20   :  { %322 = vmatprep.subr.bf16.mxu1 %v635_v21 }
  0x22   :  { %596 = vmatpush3.bf16.msra.mxu0 %v670_v48 }
  0x23   :  { %323 = vmatpush2.bf16.msra.mxu1 %v637_v22  ;;  %597 = vmatprep.subr.bf16.mxu0 %v671_v2 }
  0x24   :  { %324 = vmatprep.subr.bf16.mxu1 %v638_v23 }
  0x26   :  { %598 = vmatpush3.bf16.msra.mxu0 %v672_v3 }
  0x27   :  { %325 = vmatpush2.bf16.msra.mxu1 %v640_v24  ;;  %599 = vmatprep.subr.bf16.mxu0 %v673_v4 }
  0x28   :  { %326 = vmatprep.subr.bf16.mxu1 %v641_v25 }
  0x2a   :  { %600 = vmatpush3.bf16.msra.mxu0 %v674_v5 }
  0x2b   :  { %327 = vmatpush2.bf16.msra.mxu1 %v643_v26 }
  0x2c   :  { %328 = vmatprep.subr.bf16.mxu1 %v644_v27 }
  0x2f   :  { %329 = vmatpush2.bf16.msra.mxu1 %v646_v28 }
  0x30   :  { %330 = vmatprep.subr.bf16.mxu1 %v647_v29 }
  0x33   :  { %331 = vmatpush2.bf16.msra.mxu1 %v649_v30 }
  0x34   :  { %332 = vmatprep.subr.bf16.mxu1 %v650_v31 }
  0x37   :  { %333 = vmatpush2.bf16.msra.mxu1 %v652_v32 }
  0x38   :  { %334 = vmatprep.subr.bf16.mxu1 %v653_v33 }
  0x3b   :  { %335 = vmatpush2.bf16.msra.mxu1 %v655_v34 }
  0x3c   :  { %336 = vmatprep.subr.bf16.mxu1 %v656_v35 }
  0x3f   :  { %337 = vmatpush2.bf16.msra.mxu1 %v658_v36 }
  0xc6   :  { %v91_v56 = vpop.f32.mrf.mxu0 }
  0xc7   :  { %v92_v57 = vadd.f32 %v91_v56, %v36_v54 }
  0xc8   :  { %v93_v58 = vpop.f32.mrf.mxu0 }
  0xc9   :  { %v94_v59 = vadd.f32 %v93_v58, %v40_v55  ;;  %v98_v60 = vmax.f32 %v92_v57, 0.0 }
  0xca   :  { %v95_v61 = vpop.f32.mrf.mxu0 }
  0xcb   :  { %v99_v62 = vmax.f32 %v94_v59, 0.0  ;;  %v100_v1 = vpack.c.bf16 %v98_v60, %v98_v60 }
  0xcc   :  { %v96_v63 = vpop.f32.mrf.mxu0 }
  0xcd   :  { %v101_v0 = vpack.c.bf16 %v99_v62, %v99_v62 }
  0xcf   :  { %338 = vmatprep.mubr.bf16.mxu1 %v101_v0 }
  0xd0   :  { %339 = vmatmul.mubr.bf16.vlgmr.msra.gmra.mxu1 %v100_v1 }
 0x190   :  { %v340_v9 = vpop.f32.mrf.mxu1 }
 0x191   :  { %v341_v10 = vadd.f32 %v340_v9, %v139_v7 }
 0x192   :  { %v342_v11 = vpop.f32.mrf.mxu1 }
 0x193   :  { %v343_v12 = vadd.f32 %v342_v11, %v143_v8  ;;  %v347_v13 = vmax.f32 %v341_v10, 0.0 }
 0x194   :  { %v344_v14 = vpop.f32.mrf.mxu1 }
 0x195   :  { %v348_v15 = vmax.f32 %v343_v12, 0.0  ;;  %v349_v18 = vpack.c.bf16 %v347_v13, %v347_v13 }
 0x196   :  { %v345_v16 = vpop.f32.mrf.mxu1 }
 0x197   :  { %v350_v17 = vpack.c.bf16 %v348_v15, %v348_v15 }
 0x199   :  { %518 = vmatprep.mubr.bf16.mxu0 %v350_v17 }
 0x19a   :  { %519 = vmatmul.mubr.bf16.vlgmr.msra.gmra.mxu0 %v349_v18 }
 0x25a   :  { %v601_v19 = vpop.f32.mrf.mxu0 }
 0x25c   :  { %v602_v21 = vpop.f32.mrf.mxu0 }
 0x25d   :  { %v603_v22 = vadd.f32 %v602_v21, %v601_v19 }
 0x25e   :  { %v604_v23 = vpop.f32.mrf.mxu0 }
 0x25f   :  { %v521_v24 = vadd.f32 %v603_v22, %v568_v20 }
 0x260   :  { %v605_v25 = vpop.f32.mrf.mxu0 }
 0x261   :  { %v526_v26 = vpack.c.bf16 %v521_v24, %v521_v24 }
 0x263   :  { %528 = vst.msk [vmem:[%s888_s7] sm:$0xf] %vm527_vm1, %v526_v26 }

</bundles_post_ra>
